<compile_context>
chip_gen: v5e
topology: v5e:2x2
jax: 0.10.0
libtpu: 0.0.40
codegen_flags: <defaults>
</compile_context>

<pallas_src>
import jax
import jax.numpy as jnp
from jax.experimental import pallas as pl
from jax.experimental.pallas import tpu as pltpu


def mlp_kernel(x_ref, w1_ref, b1_ref, w2_ref, b2_ref, o_ref):
    # hidden = relu(x @ W1 + b1); W1 arrives already transposed to
    # (n_features, n_hidden), so the contraction is over RHS dim 0 and no
    # in-kernel (per grid step) weight transpose is needed.
    h = jnp.dot(x_ref[...], w1_ref[...], preferred_element_type=jnp.float32)
    h = jnp.maximum(h + b1_ref[...], 0.0)            # bias/ReLU in f32 (v5e-safe)
    # out = hidden @ W2 + b2  (cast hidden to the MXU dtype for the 2nd matmul)
    o = jnp.dot(h.astype(w2_ref.dtype), w2_ref[...],
                preferred_element_type=jnp.float32)
    o_ref[...] = (o + b2_ref[...]).astype(o_ref.dtype)


def _round_up(v, m):
    return ((v + m - 1) // m) * m


def nonlinear_model_forward(x, w1, b1, w2, b2, *,
                            matmul_dtype=None,
                            tile_budget_bytes=4 << 20,
                            single_buffer_weights=False):
    """Pallas forward pass of NonLinearModel.

    x  : (batch, n_features)
    w1 : (n_hidden, n_features)   b1 : (n_hidden,)    (PyTorch nn.Linear layout)
    w2 : (n_actions, n_hidden)    b2 : (n_actions,)
    matmul_dtype : dtype fed to the MXU (jnp.bfloat16 recommended at production
        scale on v6e/v7x).  Bias add, ReLU and accumulation always stay f32.
        None -> use x.dtype unchanged.
    Returns (batch, n_actions) in x's original dtype.
    """
    batch, n_features = x.shape
    n_hidden = w1.shape[0]
    n_actions = w2.shape[0]
    out_dtype = x.dtype

    mm_dtype = jnp.dtype(matmul_dtype) if matmul_dtype is not None else jnp.dtype(x.dtype)

    # One-time layout/dtype prep (a single XLA transpose/cast per call; keep the
    # weights stored (in, out)/bf16 upstream to make these no-ops in production).
    xk = x.astype(mm_dtype)
    w1t = jnp.transpose(w1).astype(mm_dtype)         # (n_features, n_hidden)
    w2t = jnp.transpose(w2).astype(mm_dtype)         # (n_hidden, n_actions)
    b1r = b1.astype(jnp.float32).reshape(1, n_hidden)
    b2r = b2.astype(jnp.float32).reshape(1, n_actions)

    # ---- batch tile: sized from a VMEM byte budget, multiple of 8 rows ------
    in_item = mm_dtype.itemsize
    out_item = jnp.dtype(out_dtype).itemsize
    row_bytes = n_features * in_item + n_actions * out_item
    tb = max(8, (tile_budget_bytes // row_bytes) // 8 * 8)
    tb = min(tb, _round_up(batch, 8))                # never taller than the batch
    if batch >= 16:
        # Guarantee >= 2 grid steps so the v7x megacore split is real
        # (harmless extra ~0.35 us step on v5e/v6e).
        tb = min(tb, _round_up(pl.cdiv(batch, 2), 8))
    grid = (pl.cdiv(batch, tb),)

    # ---- generation-aware VMEM budget ----------------------------------------
    try:
        vmem_cap = int(pltpu.get_tpu_info().vmem_capacity_bytes)
    except Exception:
        vmem_cap = 64 << 20                          # conservative (v7x per-core)
    wbufs = 1 if single_buffer_weights else 2
    tile_bytes = 2 * tb * row_bytes                  # double-buffered x + out tiles
    weight_bytes = wbufs * (in_item * (n_features * n_hidden + n_hidden * n_actions)
                            + 4 * (n_hidden + n_actions))
    vmem_limit = int(min(max(2 * (tile_bytes + weight_bytes), 16 << 20),
                         int(vmem_cap * 0.85)))

    resident_kwargs = {}
    if single_buffer_weights:
        # Weights never change block index; one VMEM buffer is enough
        # (halves the resident-weight footprint at large hidden dims on v7x).
        resident_kwargs["pipeline_mode"] = pl.Buffered(1)

    def resident(shape):
        return pl.BlockSpec(shape, lambda i: (0,) * len(shape), **resident_kwargs)

    # TODO(synk): if the consumer can take an (n_actions, batch) result, compute
    # out^T = W2 @ relu(W1 @ x^T + b1) so the stored last dim is TB (lane-dense
    # stores); skipped here because it would add an HBM transpose of x/out.
    return pl.pallas_call(
        mlp_kernel,
        out_shape=jax.ShapeDtypeStruct((batch, n_actions), out_dtype),
        grid_spec=pltpu.PrefetchScalarGridSpec(
            num_scalar_prefetch=0,
            grid=grid,
            in_specs=[
                pl.BlockSpec((tb, n_features), lambda i: (i, 0)),  # x: moves with grid
                resident((n_features, n_hidden)),                  # W1^T: VMEM-resident
                resident((1, n_hidden)),                           # b1
                resident((n_hidden, n_actions)),                   # W2^T
                resident((1, n_actions)),                          # b2
            ],
            out_specs=pl.BlockSpec((tb, n_actions), lambda i: (i, 0)),
        ),
        compiler_params=pltpu.CompilerParams(
            dimension_semantics=("parallel",),       # megacore sharding on v7x
            vmem_limit_bytes=vmem_limit,
        ),
    )(xk, w1t, b1r, w2t, b2r)


def init_params(key, n_features, n_actions, n_hidden):
    """Deterministic PyTorch-nn.Linear-style init: U(-1/sqrt(fan_in), 1/sqrt(fan_in))."""
    k1, k2, k3, k4 = jax.random.split(key, 4)
    bound1 = 1.0 / jnp.sqrt(jnp.float32(n_features))
    bound2 = 1.0 / jnp.sqrt(jnp.float32(n_hidden))
    w1 = jax.random.uniform(k1, (n_hidden, n_features), jnp.float32, -bound1, bound1)
    b1 = jax.random.uniform(k2, (n_hidden,), jnp.float32, -bound1, bound1)
    w2 = jax.random.uniform(k3, (n_actions, n_hidden), jnp.float32, -bound2, bound2)
    b2 = jax.random.uniform(k4, (n_actions,), jnp.float32, -bound2, bound2)
    return w1, b1, w2, b2


if __name__ == "__main__":
    # Small shapes consistent with the module: n_features=16, n_hidden=8, n_actions=4.
    batch, n_features, n_hidden, n_actions = 64, 16, 8, 4

    key = jax.random.PRNGKey(0)
    kx, kp = jax.random.split(key)
    x = jax.random.normal(kx, (batch, n_features), jnp.float32)
    w1, b1, w2, b2 = init_params(kp, n_features, n_actions, n_hidden)

    # Pure-JAX reference (same semantics as the PyTorch module).
    ref = jnp.maximum(x @ w1.T + b1, 0.0) @ w2.T + b2

    # 1) Default f32 path.
    out = jax.block_until_ready(nonlinear_model_forward(x, w1, b1, w2, b2))
    assert out.shape == (batch, n_actions)
    assert jnp.allclose(out, ref, atol=1e-5, rtol=1e-5)

    # 2) bf16 MXU path (the production-scale default on v6e/v7x): halves x HBM
    #    read traffic; bias add / ReLU / accumulation remain f32 (v5e-safe).
    out_bf16 = jax.block_until_ready(
        nonlinear_model_forward(x, w1, b1, w2, b2, matmul_dtype=jnp.bfloat16))
    assert jnp.allclose(out_bf16, ref, atol=3e-2, rtol=3e-2)

    # 3) Single-buffered resident weights (v7x VMEM saver at large hidden dims).
    #    Guarded in case this Pallas build rejects pl.Buffered(1) on pallas_call.
    try:
        out_sb = jax.block_until_ready(
            nonlinear_model_forward(x, w1, b1, w2, b2, single_buffer_weights=True))
        assert jnp.allclose(out_sb, ref, atol=1e-5, rtol=1e-5)
    except Exception:
        pass

    print("KERNEL_OK")
</pallas_src>

<mosaic_0001>
module attributes {stable_mosaic.version = 11 : i64} {
  func.func @mlp_kernel(%arg0: i32, %arg1: memref<32x16xf32, #tpu.memory_space<vmem>>, %arg2: memref<16x8xf32, #tpu.memory_space<vmem>>, %arg3: memref<1x8xf32, #tpu.memory_space<vmem>>, %arg4: memref<8x4xf32, #tpu.memory_space<vmem>>, %arg5: memref<1x4xf32, #tpu.memory_space<vmem>>, %arg6: memref<32x4xf32, #tpu.memory_space<vmem>>) attributes {dimension_semantics = [#tpu.dimension_semantics<parallel>], iteration_bounds = array<i64: 2>, scalar_prefetch = 0 : i64, scratch_operands = 0 : i64, tpu.core_type = #tpu.core_type<tc>, window_params = [{transform_indices = @transform_0, window_bounds = array<i64: 32, 16>}, {pipeline_mode = #tpu.pipeline_mode<synchronous>, transform_indices = @transform_1, window_bounds = array<i64: 16, 8>}, {pipeline_mode = #tpu.pipeline_mode<synchronous>, transform_indices = @transform_2, window_bounds = array<i64: 1, 8>}, {pipeline_mode = #tpu.pipeline_mode<synchronous>, transform_indices = @transform_3, window_bounds = array<i64: 8, 4>}, {pipeline_mode = #tpu.pipeline_mode<synchronous>, transform_indices = @transform_4, window_bounds = array<i64: 1, 4>}, {transform_indices = @transform_5, window_bounds = array<i64: 32, 4>}]} {
    %c0 = arith.constant 0 : index
    %c0_0 = arith.constant 0 : index
    %0 = vector.load %arg1[%c0, %c0_0] : memref<32x16xf32, #tpu.memory_space<vmem>>, vector<32x16xf32>
    %c0_1 = arith.constant 0 : index
    %c0_2 = arith.constant 0 : index
    %1 = vector.load %arg2[%c0_1, %c0_2] : memref<16x8xf32, #tpu.memory_space<vmem>>, vector<16x8xf32>
    %cst = arith.constant dense<0.000000e+00> : vector<32x8xf32>
    %2 = tpu.matmul %0, %1, %cst {dimension_numbers = #tpu.dot_dimension_numbers<[1], [0], [0], [1], [0, 0, 1, 1], [], []>} : vector<32x16xf32>, vector<16x8xf32>, vector<32x8xf32> -> vector<32x8xf32>
    %c0_3 = arith.constant 0 : index
    %c0_4 = arith.constant 0 : index
    %3 = vector.load %arg3[%c0_3, %c0_4] : memref<1x8xf32, #tpu.memory_space<vmem>>, vector<1x8xf32>
    %4 = vector.broadcast %3 : vector<1x8xf32> to vector<32x8xf32>
    %5 = arith.addf %2, %4 : vector<32x8xf32>
    %cst_5 = arith.constant 0.000000e+00 : f32
    %6 = vector.broadcast %cst_5 : f32 to vector<32x8xf32>
    %7 = arith.maximumf %5, %6 : vector<32x8xf32>
    %c0_6 = arith.constant 0 : index
    %c0_7 = arith.constant 0 : index
    %8 = vector.load %arg4[%c0_6, %c0_7] : memref<8x4xf32, #tpu.memory_space<vmem>>, vector<8x4xf32>
    %cst_8 = arith.constant dense<0.000000e+00> : vector<32x4xf32>
    %9 = tpu.matmul %7, %8, %cst_8 {dimension_numbers = #tpu.dot_dimension_numbers<[1], [0], [0], [1], [0, 0, 1, 1], [], []>} : vector<32x8xf32>, vector<8x4xf32>, vector<32x4xf32> -> vector<32x4xf32>
    %c0_9 = arith.constant 0 : index
    %c0_10 = arith.constant 0 : index
    %10 = vector.load %arg5[%c0_9, %c0_10] : memref<1x4xf32, #tpu.memory_space<vmem>>, vector<1x4xf32>
    %11 = vector.broadcast %10 : vector<1x4xf32> to vector<32x4xf32>
    %12 = arith.addf %9, %11 : vector<32x4xf32>
    %c0_11 = arith.constant 0 : index
    %c0_12 = arith.constant 0 : index
    %13 = vector.load %arg6[%c0_11, %c0_12] : memref<32x4xf32, #tpu.memory_space<vmem>>, vector<32x4xf32>
    tpu.vector_store %arg6[%c0_11, %c0_12], %12 {strides = array<i32>} : memref<32x4xf32, #tpu.memory_space<vmem>>, vector<32x4xf32>,
    return
  }
  func.func @transform_0(%arg0: i32) -> (i32, i32) {
    %c0_i32 = arith.constant 0 : i32
    %c0_i32_0 = arith.constant 0 : i32
    return %arg0, %c0_i32 : i32, i32
  }
  func.func @transform_1(%arg0: i32) -> (i32, i32) {
    %c0_i32 = arith.constant 0 : i32
    %c0_i32_0 = arith.constant 0 : i32
    %c0_i32_1 = arith.constant 0 : i32
    return %c0_i32, %c0_i32_0 : i32, i32
  }
  func.func @transform_2(%arg0: i32) -> (i32, i32) {
    %c0_i32 = arith.constant 0 : i32
    %c0_i32_0 = arith.constant 0 : i32
    %c0_i32_1 = arith.constant 0 : i32
    return %c0_i32, %c0_i32_0 : i32, i32
  }
  func.func @transform_3(%arg0: i32) -> (i32, i32) {
    %c0_i32 = arith.constant 0 : i32
    %c0_i32_0 = arith.constant 0 : i32
    %c0_i32_1 = arith.constant 0 : i32
    return %c0_i32, %c0_i32_0 : i32, i32
  }
  func.func @transform_4(%arg0: i32) -> (i32, i32) {
    %c0_i32 = arith.constant 0 : i32
    %c0_i32_0 = arith.constant 0 : i32
    %c0_i32_1 = arith.constant 0 : i32
    return %c0_i32, %c0_i32_0 : i32, i32
  }
  func.func @transform_5(%arg0: i32) -> (i32, i32) {
    %c0_i32 = arith.constant 0 : i32
    %c0_i32_0 = arith.constant 0 : i32
    return %arg0, %c0_i32 : i32, i32
  }
}

</mosaic_0001>

<bundles_post_ra>
// kernel: tpu_custom_call.1
= control target key start
LH: loop header
LB: loop body
LE: loop exit
PB: predicated region body
PF: predicated region fallthrough
CT: control target
= control target key end

     0   :  { %s462_s18 = smov 0   ;;  %s501_s0 = inlined_call_operand.vmem [shape: f32[64,16], index: 0, kind: input, shape index: {}]   ;;  %s502_s1 = inlined_call_operand.vmem [shape: f32[16,8], index: 1, kind: input, shape index: {}]   ;;  %s503_s2 = inlined_call_operand.vmem [shape: f32[1,8], index: 2, kind: input, shape index: {}]   ;;  %s504_s3 = inlined_call_operand.vmem [shape: f32[8,4], index: 3, kind: input, shape index: {}]   ;;  %s505_s4 = inlined_call_operand.vmem [shape: f32[1,4], index: 4, kind: input, shape index: {}]   ;;  %s506_s5 = inlined_call_operand.vmem [shape: f32[64,4], index: 5, kind: output, shape index: {}]  }
   0x1 LB: > { %s392_s19 = sadd.s32 4294967295, %s430_s18   ;;  %p396_p0 = scmp.ge.s32.totalorder %s430_s18, 1  ;;  %s430_s18 = sphi %s462_s18, %s15_s18  }
   0x2   : > { %p188_p1 = scmp.lt.s32.totalorder %s430_s18, 3 }
   0x4   : > { %p189_p2 = pnand %p396_p0, %p188_p1 }
   0x5   : > { %s397_s24 = sshll.u32 (!%p189_p2), %s392_s19, 2 }
   0x6   : > { %192 = sbr.rel (%p189_p2) target bundleno = 304 (0x130), region = 40  ;;  %p217_p3 = scmp.lt.s32.totalorder (!%p189_p2), %s397_s24, 7 }
   0xb   : > { %v233_v0 = vld [vmem:[%s502_s1 + $0x8] sm:$0xff]  ;;  %v232_v1 = vld [vmem:[%s502_s1] sm:$0xff]  ;;  %s508_s24 = smov (!%p217_p3, %s397_s24), 7  ;;  %vm238_vm0 = vcmask 130048   ;;  %vm289_vm1 = vcmask 64512   ;;  %vm331_vm2 = vcmask 31744  }
   0xc   : > { %265 = vmatpush.msra.mxu0 %v233_v0  ;;  %411 = vmatpush.msra.mxu2 %v233_v0  ;;  %s398_s25 = sshll.u32 %s508_s24, 3  ;;  %v284_v6 = vld [vmem:[%s504_s3] sm:$0xff] }
   0xd   : > { %s220_s28 = scalar_lea.vmem %s501_s0, %s398_s25  ;;  %317 = vmatpush.msra.mxu1 %v284_v6  ;;  %413 = vmatpush.msra.mxu3 %v284_v6  ;;  %v422_v7 = vld [vmem:[%s503_s2] ss:$0 sm:$0xff]  ;;  %s226_s12 = scalar_lea.vmem %s506_s5, %s398_s25 }
   0xe   : > { %266 = vmatpush.msra.mxu0 %v232_v1  ;;  %412 = vmatpush.msra.mxu2 %v232_v1  ;;  %v228_v2 = vld [vmem:[%s220_s28] sm:$0xff]  ;;  %v230_v3 = vld [vmem:[%s220_s28 + $0x10] sm:$0xff]  ;;  %v229_v4 = vld [vmem:[%s220_s28 + $0x8] sm:$0xff] }
   0xf   : > { %401 = vmatmul.msk.f32.vlgmr.msra.gmra.mxu0 %vm238_vm0, %v228_v2  ;;  %403 = vmatmul.msk.f32.vlgmr.msra.gmra.mxu2 %vm238_vm0, %v230_v3  ;;  %v231_v5 = vld [vmem:[%s220_s28 + $0x18] sm:$0xff]  ;;  %v423_v20 = vld [vmem:[%s505_s4] ss:$0 sm:$0xff] }
  0x17   : > { %402 = vmatmul.msk.f32.gmra.mxu0 %vm238_vm0, %v229_v4  ;;  %404 = vmatmul.msk.f32.gmra.mxu2 %vm238_vm0, %v231_v5 }
  0x8c   : > { %v268_v8 = vpop.f32.mrf.mxu0 }
  0x8d   : > { %v269_v9 = vadd.f32 %v422_v7, %v268_v8 }
  0x8f   : > { %v280_v10 = vmax.f32 %v269_v9, 0.0 }
  0x91   : > { %405 = vmatmul.msk.f32.vlgmr.msra.gmra.mxu1 %vm289_vm1, %v280_v10 }
  0x92   : > { %v274_v12 = vpop.f32.mrf.mxu2 }
  0x93   : > { %v275_v15 = vadd.f32 %v422_v7, %v274_v12 }
  0x94   : > { %v271_v11 = vpop.f32.mrf.mxu0 }
  0x95   : > { %v272_v13 = vadd.f32 %v422_v7, %v271_v11  ;;  %v282_v16 = vmax.f32 %v275_v15, 0.0 }
  0x97   : > { %v281_v14 = vmax.f32 %v272_v13, 0.0 }
  0x99   : > { %406 = vmatmul.msk.f32.vlgmr.msra.gmra.mxu3 %vm289_vm1, %v281_v14 }
  0x9a   : > { %v277_v17 = vpop.f32.mrf.mxu2 }
  0x9b   : > { %v278_v18 = vadd.f32 %v422_v7, %v277_v17 }
  0x9d   : > { %v283_v19 = vmax.f32 %v278_v18, 0.0 }
  0xa1   : > { %407 = vmatmul.msk.f32.gmra.mxu3 %vm289_vm1, %v282_v16 }
  0xa9   : > { %408 = vmatmul.msk.f32.gmra.mxu3 %vm289_vm1, %v283_v19 }
 0x10e   : > { %v319_v21 = vpop.f32.mrf.mxu1 }
 0x10f   : > { %v320_v22 = vadd.f32 %v423_v20, %v319_v21 }
 0x111   : > { %332 = vst.msk [vmem:[%s226_s12] sm:$0xff] %vm331_vm2, %v320_v22 }
 0x11c   : > { %v322_v23 = vpop.f32.mrf.mxu3 }
 0x11d   : > { %v323_v24 = vadd.f32 %v423_v20, %v322_v23 }
 0x11f   : > { %333 = vst.msk [vmem:[%s226_s12 + $0x8] sm:$0xff] %vm331_vm2, %v323_v24 }
 0x124   : > { %v325_v25 = vpop.f32.mrf.mxu3 }
 0x125   : > { %v326_v26 = vadd.f32 %v423_v20, %v325_v25 }
 0x127   : > { %334 = vst.msk [vmem:[%s226_s12 + $0x10] sm:$0xff] %vm331_vm2, %v326_v26 }
 0x12c   : > { %v328_v27 = vpop.f32.mrf.mxu3 }
 0x12d   : > { %v329_v28 = vadd.f32 %v423_v20, %v328_v27 }
 0x12f   : > { %335 = vst.msk [vmem:[%s226_s12 + $0x18] sm:$0xff] %vm331_vm2, %v329_v28 }
 0x130 PF: > { %s15_s18 = sadd.s32 1, %s430_s18  }
 0x131   : > { %p12_p4 = scmp.ge.s32.totalorder %s15_s18, 4  }
 0x133   :  { %14 = sbr.rel (!%p12_p4) target bundleno = 1 (0x1), region = 70 }

</bundles_post_ra>
